<compile_context>
chip_gen: v7x
topology: tpu7x:2x2x1
jax: 0.10.0
libtpu: 0.0.40
codegen_flags: <defaults>
</compile_context>

<pallas_src>
import jax
import jax.numpy as jnp
from jax.experimental import pallas as pl
from jax.experimental.pallas import tpu as pltpu


def _identity_kernel(x_ref, o_ref):
    # Pure pass-through of the current VMEM tile (output aliases the input
    # buffer in HBM, so this is a value-preserving in-place write).
    o_ref[...] = x_ref[...]


def identity(x: jax.Array) -> jax.Array:
    """Identity forward pass: returns x unchanged (same shape & dtype)."""
    if x.size == 0:
        return x

    orig_shape = x.shape
    n = x.size
    itemsize = jnp.dtype(x.dtype).itemsize
    # Packed sublane count per vreg for this dtype: 8 (f32), 16 (bf16), 32 (i8).
    sublane_pack = max(1, 32 // (itemsize * 8)) * 8

    # Prefer a lane-dense last dim (wide, multiple of 128) that divides n
    # exactly -> no padding needed.
    cols = 0
    for c in (4096, 2048, 1024, 512, 256, 128):
        if n % c == 0:
            cols = c
            break

    total_bytes = n * itemsize
    if cols == 0 or total_bytes <= (4 << 20):
        # Single whole-array block. Full-extent block dims are exempt from the
        # (8,128) divisibility rule, so no padding / slicing is ever required.
        slab = x.reshape(1, n)
        rows, cols = 1, n
        tile_rows = 1
        grid = (1,)
    else:
        rows = n // cols
        slab = x.reshape(rows, cols)
        # ~2 MiB blocks (in + out double-buffered = ~8 MiB, safe on v5e/v6e/v7x),
        # rounded to the packed-sublane count for this dtype.
        target_rows = max(sublane_pack, (2 << 20) // (cols * itemsize))
        tile_rows = min(rows, (target_rows // sublane_pack) * sublane_pack)
        tile_rows = max(tile_rows, sublane_pack)
        grid = (pl.cdiv(rows, tile_rows),)  # ragged final block handled by Pallas

    block = (tile_rows, cols)

    out = pl.pallas_call(
        _identity_kernel,
        out_shape=jax.ShapeDtypeStruct(slab.shape, slab.dtype),
        grid_spec=pltpu.PrefetchScalarGridSpec(
            num_scalar_prefetch=0,
            grid=grid,
            in_specs=[pl.BlockSpec(block, lambda i: (i, 0))],
            out_specs=pl.BlockSpec(block, lambda i: (i, 0)),
        ),
        # Alias input 0 -> output 0: no second HBM buffer is allocated.
        input_output_aliases={0: 0},
        compiler_params=pltpu.CompilerParams(
            # No-op on v5e/v6e (1 TC); shards the grid across both TCs on v7x.
            dimension_semantics=("parallel",),
        ),
    )(slab)

    # No padding was added and dtype never changes: a single reshape suffices.
    return out.reshape(orig_shape)


if __name__ == "__main__":
    key = jax.random.PRNGKey(0)
    x = jax.random.normal(key, (2, 4, 16, 16), dtype=jnp.float32)  # NCHW

    y = jax.jit(identity)(x)
    jax.block_until_ready(y)

    assert y.shape == x.shape, (y.shape, x.shape)
    assert y.dtype == x.dtype, (y.dtype, x.dtype)
    assert bool(jnp.all(y == x)), "identity output mismatch"

    print("KERNEL_OK")
</pallas_src>

<mosaic_0001>
module attributes {stable_mosaic.version = 11 : i64} {
  func.func @_identity_kernel(%arg0: i32, %arg1: memref<1x2048xf32, #tpu.memory_space<vmem>>, %arg2: memref<1x2048xf32, #tpu.memory_space<vmem>>) attributes {dimension_semantics = [#tpu.dimension_semantics<parallel>], iteration_bounds = array<i64: 1>, scalar_prefetch = 0 : i64, scratch_operands = 0 : i64, tpu.core_type = #tpu.core_type<tc>, window_params = [{transform_indices = @transform_0, window_bounds = array<i64: 1, 2048>}, {transform_indices = @transform_1, window_bounds = array<i64: 1, 2048>}]} {
    %c0 = arith.constant 0 : index
    %c0_0 = arith.constant 0 : index
    %0 = vector.load %arg1[%c0, %c0_0] : memref<1x2048xf32, #tpu.memory_space<vmem>>, vector<1x2048xf32>
    %c0_1 = arith.constant 0 : index
    %c0_2 = arith.constant 0 : index
    %1 = vector.load %arg2[%c0_1, %c0_2] : memref<1x2048xf32, #tpu.memory_space<vmem>>, vector<1x2048xf32>
    tpu.vector_store %arg2[%c0_1, %c0_2], %0 {strides = array<i32>} : memref<1x2048xf32, #tpu.memory_space<vmem>>, vector<1x2048xf32>,
    return
  }
  func.func @transform_0(%arg0: i32) -> (i32, i32) {
    %c0_i32 = arith.constant 0 : i32
    %c0_i32_0 = arith.constant 0 : i32
    return %arg0, %c0_i32 : i32, i32
  }
  func.func @transform_1(%arg0: i32) -> (i32, i32) {
    %c0_i32 = arith.constant 0 : i32
    %c0_i32_0 = arith.constant 0 : i32
    return %arg0, %c0_i32 : i32, i32
  }
}

</mosaic_0001>

<bundles_post_ra>
// kernel: identity.1
= control target key start
LH: loop header
LB: loop body
LE: loop exit
PB: predicated region body
PF: predicated region fallthrough
CT: control target
= control target key end

     0   :  { %s38_s0 = inlined_call_operand.vmem [shape: f32[1,2048], index: 0, kind: input, shape index: {}, may-alias: {0,1}]   ;;  %s39_s1 = inlined_call_operand.vmem [shape: f32[1,2048], index: 1, kind: output, shape index: {}, may-alias: {0,1}]  }
   0x1   :  { %v8_v0 = vld [vmem:[%s38_s0] sm:$0xff]  ;;  %v9_v1 = vld [vmem:[%s38_s0 + $0x8] sm:$0xff] }
   0x2   :  { %10 = vst [vmem:[%s39_s1] sm:$0xff] %v8_v0  ;;  %11 = vst [vmem:[%s39_s1 + $0x8] sm:$0xff] %v9_v1 }

</bundles_post_ra>
